<compile_context>
chip_gen: v7x
topology: tpu7x:2x2x1
jax: 0.10.0
libtpu: 0.0.40
codegen_flags: <defaults>
</compile_context>

<pallas_src>
import functools
import math

import jax
import jax.numpy as jnp
from jax import lax
from jax.experimental import pallas as pl
from jax.experimental.pallas import tpu as pltpu


def _round_up(x, m):
    return (x + m - 1) // m * m


def _memory_unit_kernel(q_ref, w_ref, c_ref, out_ref, gpart_ref, spart_ref, *,
                        n_total, tile_n, fea_dim, mem_dim):
    i = pl.program_id(0)
    t, f, m = tile_n, fea_dim, mem_dim

    q_raw = q_ref[...]                       # single VMEM->vreg load of the tile
    q = q_raw.astype(jnp.float32)            # (T, F) f32 for the loss math
    q_bf = q_raw.astype(jnp.bfloat16)        # bf16 MXU operand
    w_bf = w_ref[...]                        # (M, F), already bf16

    # logits = q @ w.T : contract the last axis of both operands (no w.T).
    logits = lax.dot_general(q_bf, w_bf, (((1,), (1,)), ((), ())),
                             preferred_element_type=jnp.float32)      # (T, M)

    # softmax over memory slots (f32; reciprocal on the EUP slot)
    lmax = jnp.max(logits, axis=1, keepdims=True)                     # top-1 logit
    e = jnp.exp(logits - lmax)
    denom = jnp.sum(e, axis=1, keepdims=True)
    score = e * pl.reciprocal(denom, approx=True)                     # (T, M)

    # mem = score @ w   (bf16 MXU, f32 accumulate)
    mem = jnp.dot(score.astype(jnp.bfloat16), w_bf,
                  preferred_element_type=jnp.float32)                 # (T, F)

    # Fused output: [query | mem] — no wrapper concat pass.
    out_ref[:, :f] = q_raw.astype(out_ref.dtype)
    out_ref[:, f:] = mem.astype(out_ref.dtype)

    # row-validity for the (possibly ragged) final tile.  Use where-selects,
    # not multiplies, so NaN/Inf in out-of-bounds rows can't poison the sums.
    row = i * t + lax.broadcasted_iota(jnp.int32, (t, 1), 0)
    row_ok = row < n_total                                            # (T, 1)

    # gather_loss partial: sum((query - score)^2) over valid rows
    # (requires mem_dim == fea_dim, exactly as in the PyTorch reference MSE).
    gsum = jnp.sum(jnp.where(row_ok, (q - score) ** 2, 0.0))

    # spread_loss: top-1 / top-2 slots picked on logits (softmax is monotone).
    # pairwise_distance expanded algebraically with the per-slot constant
    # prefolded in the wrapper:
    #   ||q - w_k + eps||^2 = ||q||^2 + 2*eps*sum(q) - 2 q.w_k + c_k
    #   c_k = ||w_k||^2 - 2*eps*sum(w_k) + F*eps^2
    lane = lax.broadcasted_iota(jnp.int32, (t, m), 1)
    idx0 = jnp.min(jnp.where(logits == lmax, lane, m), axis=1, keepdims=True)
    masked = jnp.where(lane == idx0, -jnp.inf, logits)
    l1 = jnp.max(masked, axis=1, keepdims=True)                       # top-2 logit
    # min-index tie-break kept (matches torch.topk; avoids double-counting c_k)
    idx1 = jnp.min(jnp.where(masked == l1, lane, m), axis=1, keepdims=True)

    c = c_ref[...]                                                    # (1, M)
    pos_c = jnp.sum(jnp.where(lane == idx0, c, 0.0), axis=1, keepdims=True)
    neg_c = jnp.sum(jnp.where(lane == idx1, c, 0.0), axis=1, keepdims=True)

    qsq = jnp.sum(q * q, axis=1, keepdims=True)
    qsum = jnp.sum(q, axis=1, keepdims=True)
    eps = jnp.float32(1e-6)   # torch.pairwise_distance adds eps INSIDE the norm
    base = qsq + 2.0 * eps * qsum
    d_pos = jnp.sqrt(jnp.maximum(base - 2.0 * lmax + pos_c, 0.0))
    d_neg = jnp.sqrt(jnp.maximum(base - 2.0 * l1 + neg_c, 0.0))
    hinge = jnp.maximum(d_pos - d_neg + 1.0, 0.0)                     # margin = 1.0
    ssum = jnp.sum(jnp.where(row_ok, hinge, 0.0))

    # lane-dense (1, 8, 128) partial-sum slabs (full unmasked stores, ~4 KiB);
    # element [0, 0] is read and reduced outside the kernel.
    gpart_ref[...] = jnp.full(gpart_ref.shape, gsum, jnp.float32)
    spart_ref[...] = jnp.full(spart_ref.shape, ssum, jnp.float32)


def memory_unit_forward(query, weight, s=None, shrink_thres=0.0025, *, tile_n=2048):
    """query: (B, H, W, fea_dim) NHWC;  weight: (mem_dim, fea_dim).

    Returns (output (N, 2*fea_dim), gather_loss scalar, spread_loss scalar),
    mirroring MemoryUnit.forward.  `s` / `shrink_thres` are unused by the
    reference forward and kept only for signature parity.
    """
    del s, shrink_thres  # unused by the reference forward
    b, h, wd, f = query.shape
    m, f2 = weight.shape
    assert f == f2, "fea_dim mismatch between query and weight"
    assert m == f, "reference gather_loss (MSE of query vs score) needs mem_dim == fea_dim"
    n = b * h * wd

    q2d = query.reshape(n, f)
    w32 = weight.astype(jnp.float32)
    w_bf = weight.astype(jnp.bfloat16)       # MXU operand dtype, cast once here

    # Per-slot constant for the algebraic triplet distance (f32, from f32 weight).
    eps = 1e-6
    c = (jnp.sum(w32 * w32, axis=1) - 2.0 * eps * jnp.sum(w32, axis=1)
         + f * eps * eps).reshape(1, m)

    # N tile: biggest that's useful, multiple of 8; Pallas masks the ragged tail.
    tile = min(_round_up(tile_n, 8), _round_up(n, 8))
    num_tiles = pl.cdiv(n, tile)

    kernel = functools.partial(_memory_unit_kernel, n_total=n, tile_n=tile,
                               fea_dim=f, mem_dim=m)

    cost = pl.CostEstimate(
        flops=4 * n * m * f,                           # two (N,M,F) matmuls
        transcendentals=n * m,                         # exp in the softmax
        bytes_accessed=4 * n * f + 2 * m * f + 4 * n * 2 * f,
    )

    # Double-buffered q + fused output blocks + resident bf16 weight; cap the
    # scoped-VMEM request at 48 MiB so it stays inside v7x's 64 MiB physical.
    vmem_need = 2 * (tile * f * 4 + tile * 2 * f * 4) + m * f * 2 + 4 * (8 * 128 * 4)
    vmem_limit = int(min(max(32 * 1024 * 1024, vmem_need * 3 // 2),
                         48 * 1024 * 1024))

    out, gpart, spart = pl.pallas_call(
        kernel,
        out_shape=(
            jax.ShapeDtypeStruct((n, 2 * f), query.dtype),       # fused [q | mem]
            jax.ShapeDtypeStruct((num_tiles, 8, 128), jnp.float32),
            jax.ShapeDtypeStruct((num_tiles, 8, 128), jnp.float32),
        ),
        grid=(num_tiles,),
        in_specs=[
            pl.BlockSpec((tile, f), lambda i: (i, 0)),           # query rows, pipelined
            pl.BlockSpec((m, f), lambda i: (0, 0)),              # bf16 weight, resident
            pl.BlockSpec((1, m), lambda i: (0, 0)),              # per-slot constant
        ],
        out_specs=(
            pl.BlockSpec((tile, 2 * f), lambda i: (i, 0)),       # fused output rows
            pl.BlockSpec((1, 8, 128), lambda i: (i, 0, 0)),      # gather partial sums
            pl.BlockSpec((1, 8, 128), lambda i: (i, 0, 0)),      # spread partial sums
        ),
        compiler_params=pltpu.CompilerParams(
            dimension_semantics=("parallel",),
            vmem_limit_bytes=vmem_limit,
        ),
        cost_estimate=cost,
    )(q2d, w_bf, c)

    gather_loss = jnp.sum(gpart[:, 0, 0]) / jnp.float32(n * f)   # MSE mean
    spread_loss = jnp.sum(spart[:, 0, 0]) / jnp.float32(n)       # triplet mean
    return out, gather_loss, spread_loss


if __name__ == "__main__":
    key = jax.random.PRNGKey(0)
    kq, kw = jax.random.split(key)

    # mem_dim == fea_dim required for the reference's gather_loss (MSE of
    # query vs score) to be shape-consistent.
    mem_dim = 128
    fea_dim = 128
    B, H, W = 2, 4, 4

    query = jax.random.normal(kq, (B, H, W, fea_dim), dtype=jnp.float32)

    # Deterministic reset_parameters(): uniform(-stdv, stdv), stdv = 1/sqrt(fea_dim)
    stdv = 1.0 / math.sqrt(fea_dim)
    weight = jax.random.uniform(
        kw, (mem_dim, fea_dim), minval=-stdv, maxval=stdv, dtype=jnp.float32
    )

    s = None  # unused by forward; kept for signature parity with the module
    out, gather_loss, spread_loss = memory_unit_forward(query, weight, s)
    jax.block_until_ready((out, gather_loss, spread_loss))

    assert out.shape == (B * H * W, 2 * fea_dim)
    assert gather_loss.shape == () and spread_loss.shape == ()
    assert bool(jnp.isfinite(gather_loss)) and bool(jnp.isfinite(spread_loss))
    print("KERNEL_OK")
</pallas_src>

<mosaic_0001>
module attributes {stable_mosaic.version = 11 : i64} {
  func.func @_memory_unit_kernel(%arg0: i32, %arg1: memref<32x128xf32, #tpu.memory_space<vmem>>, %arg2: memref<128x128xbf16, #tpu.memory_space<vmem>>, %arg3: memref<1x128xf32, #tpu.memory_space<vmem>>, %arg4: memref<32x256xf32, #tpu.memory_space<vmem>>, %arg5: memref<1x8x128xf32, #tpu.memory_space<vmem>>, %arg6: memref<1x8x128xf32, #tpu.memory_space<vmem>>) attributes {dimension_semantics = [#tpu.dimension_semantics<parallel>], iteration_bounds = array<i64: 1>, scalar_prefetch = 0 : i64, scratch_operands = 0 : i64, tpu.core_type = #tpu.core_type<tc>, window_params = [{transform_indices = @transform_0, window_bounds = array<i64: 32, 128>}, {pipeline_mode = #tpu.pipeline_mode<synchronous>, transform_indices = @transform_1, window_bounds = array<i64: 128, 128>}, {pipeline_mode = #tpu.pipeline_mode<synchronous>, transform_indices = @transform_2, window_bounds = array<i64: 1, 128>}, {transform_indices = @transform_3, window_bounds = array<i64: 32, 256>}, {transform_indices = @transform_4, window_bounds = array<i64: 1, 8, 128>}, {transform_indices = @transform_5, window_bounds = array<i64: 1, 8, 128>}]} {
    %c0 = arith.constant 0 : index
    %c0_0 = arith.constant 0 : index
    %0 = vector.load %arg1[%c0, %c0_0] : memref<32x128xf32, #tpu.memory_space<vmem>>, vector<32x128xf32>
    %1 = arith.truncf %0 : vector<32x128xf32> to vector<32x128xbf16>
    %c0_1 = arith.constant 0 : index
    %c0_2 = arith.constant 0 : index
    %2 = vector.load %arg2[%c0_1, %c0_2] : memref<128x128xbf16, #tpu.memory_space<vmem>>, vector<128x128xbf16>
    %cst = arith.constant dense<0.000000e+00> : vector<32x128xf32>
    %3 = tpu.matmul %1, %2, %cst {dimension_numbers = #tpu.dot_dimension_numbers<[1], [1], [0], [0], [0, 0, 1, 0], [], []>} : vector<32x128xbf16>, vector<128x128xbf16>, vector<32x128xf32> -> vector<32x128xf32>
    %cst_3 = arith.constant dense<0xFF800000> : vector<32xf32>
    %4 = vector.multi_reduction <maximumf>, %3, %cst_3 [1] : vector<32x128xf32> to vector<32xf32>
    %5 = vector.shape_cast %4 : vector<32xf32> to vector<32x1xf32>
    %6 = vector.broadcast %5 : vector<32x1xf32> to vector<32x128xf32>
    %7 = arith.subf %3, %6 : vector<32x128xf32>
    %8 = math.exp %7 : vector<32x128xf32>
    %cst_4 = arith.constant dense<0.000000e+00> : vector<32xf32>
    %9 = vector.multi_reduction <add>, %8, %cst_4 [1] : vector<32x128xf32> to vector<32xf32>
    %10 = vector.shape_cast %9 : vector<32xf32> to vector<32x1xf32>
    %11 = tpu.reciprocal %10 {approx = true} : vector<32x1xf32> -> vector<32x1xf32>
    %12 = vector.broadcast %11 : vector<32x1xf32> to vector<32x128xf32>
    %13 = arith.mulf %8, %12 : vector<32x128xf32>
    %14 = arith.truncf %13 : vector<32x128xf32> to vector<32x128xbf16>
    %cst_5 = arith.constant dense<0.000000e+00> : vector<32x128xf32>
    %15 = tpu.matmul %14, %2, %cst_5 {dimension_numbers = #tpu.dot_dimension_numbers<[1], [0], [0], [1], [0, 0, 1, 1], [], []>} : vector<32x128xbf16>, vector<128x128xbf16>, vector<32x128xf32> -> vector<32x128xf32>
    %c0_6 = arith.constant 0 : index
    %c0_7 = arith.constant 0 : index
    %16 = vector.load %arg4[%c0_6, %c0_7] : memref<32x256xf32, #tpu.memory_space<vmem>>, vector<32x128xf32>
    tpu.vector_store %arg4[%c0_6, %c0_7], %0 {strides = array<i32>} : memref<32x256xf32, #tpu.memory_space<vmem>>, vector<32x128xf32>,
    %c0_8 = arith.constant 0 : index
    %c128 = arith.constant 128 : index
    %17 = vector.load %arg4[%c0_8, %c128] : memref<32x256xf32, #tpu.memory_space<vmem>>, vector<32x128xf32>
    tpu.vector_store %arg4[%c0_8, %c128], %15 {strides = array<i32>} : memref<32x256xf32, #tpu.memory_space<vmem>>, vector<32x128xf32>,
    %c32_i32 = arith.constant 32 : i32
    %18 = arith.muli %arg0, %c32_i32 : i32
    %19 = tpu.iota {dimensions = array<i32: 0>} : vector<32x1xi32>
    %20 = vector.broadcast %18 : i32 to vector<32x1xi32>
    %21 = arith.addi %20, %19 : vector<32x1xi32>
    %c32_i32_9 = arith.constant 32 : i32
    %22 = vector.broadcast %c32_i32_9 : i32 to vector<32x1xi32>
    %23 = arith.cmpi slt, %21, %22 : vector<32x1xi32>
    %24 = arith.subf %0, %13 : vector<32x128xf32>
    %25 = arith.mulf %24, %24 : vector<32x128xf32>
    %cst_10 = arith.constant 0.000000e+00 : f32
    %26 = vector.shape_cast %23 : vector<32x1xi1> to vector<32x1xi1>
    %27 = vector.broadcast %26 : vector<32x1xi1> to vector<32x128xi1>
    %28 = vector.broadcast %cst_10 : f32 to vector<32x128xf32>
    %29 = arith.select %27, %25, %28 : vector<32x128xi1>, vector<32x128xf32>
    %30 = vector.shape_cast %29 : vector<32x128xf32> to vector<1x32x128xf32>
    %cst_11 = arith.constant dense<0.000000e+00> : vector<1xf32>
    %31 = vector.multi_reduction <add>, %30, %cst_11 [1, 2] : vector<1x32x128xf32> to vector<1xf32>
    %32 = vector.shape_cast %31 : vector<1xf32> to vector<1x1x1xf32>
    %33 = vector.extract %32[0, 0, 0] : f32 from vector<1x1x1xf32>
    %34 = tpu.iota {dimensions = array<i32: 1>} : vector<32x128xi32>
    %35 = vector.broadcast %5 : vector<32x1xf32> to vector<32x128xf32>
    %36 = arith.cmpf oeq, %3, %35 : vector<32x128xf32>
    %c128_i32 = arith.constant 128 : i32
    %37 = vector.broadcast %c128_i32 : i32 to vector<32x128xi32>
    %38 = arith.select %36, %34, %37 : vector<32x128xi1>, vector<32x128xi32>
    %cst_12 = arith.constant dense<2147483647> : vector<32xi32>
    %39 = vector.multi_reduction <minsi>, %38, %cst_12 [1] : vector<32x128xi32> to vector<32xi32>
    %40 = vector.shape_cast %39 : vector<32xi32> to vector<32x1xi32>
    %41 = vector.broadcast %40 : vector<32x1xi32> to vector<32x128xi32>
    %42 = arith.cmpi eq, %34, %41 : vector<32x128xi32>
    %cst_13 = arith.constant 0xFF800000 : f32
    %43 = vector.broadcast %cst_13 : f32 to vector<32x128xf32>
    %44 = arith.select %42, %43, %3 : vector<32x128xi1>, vector<32x128xf32>
    %cst_14 = arith.constant dense<0xFF800000> : vector<32xf32>
    %45 = vector.multi_reduction <maximumf>, %44, %cst_14 [1] : vector<32x128xf32> to vector<32xf32>
    %46 = vector.shape_cast %45 : vector<32xf32> to vector<32x1xf32>
    %47 = vector.broadcast %46 : vector<32x1xf32> to vector<32x128xf32>
    %48 = arith.cmpf oeq, %44, %47 : vector<32x128xf32>
    %c128_i32_15 = arith.constant 128 : i32
    %49 = vector.broadcast %c128_i32_15 : i32 to vector<32x128xi32>
    %50 = arith.select %48, %34, %49 : vector<32x128xi1>, vector<32x128xi32>
    %cst_16 = arith.constant dense<2147483647> : vector<32xi32>
    %51 = vector.multi_reduction <minsi>, %50, %cst_16 [1] : vector<32x128xi32> to vector<32xi32>
    %52 = vector.shape_cast %51 : vector<32xi32> to vector<32x1xi32>
    %c0_17 = arith.constant 0 : index
    %c0_18 = arith.constant 0 : index
    %53 = vector.load %arg3[%c0_17, %c0_18] : memref<1x128xf32, #tpu.memory_space<vmem>>, vector<1x128xf32>
    %54 = vector.broadcast %40 : vector<32x1xi32> to vector<32x128xi32>
    %55 = arith.cmpi eq, %34, %54 : vector<32x128xi32>
    %cst_19 = arith.constant 0.000000e+00 : f32
    %56 = vector.shape_cast %53 : vector<1x128xf32> to vector<1x128xf32>
    %57 = vector.broadcast %56 : vector<1x128xf32> to vector<32x128xf32>
    %58 = vector.broadcast %cst_19 : f32 to vector<32x128xf32>
    %59 = arith.select %55, %57, %58 : vector<32x128xi1>, vector<32x128xf32>
    %cst_20 = arith.constant dense<0.000000e+00> : vector<32xf32>
    %60 = vector.multi_reduction <add>, %59, %cst_20 [1] : vector<32x128xf32> to vector<32xf32>
    %61 = vector.shape_cast %60 : vector<32xf32> to vector<32x1xf32>
    %62 = vector.broadcast %52 : vector<32x1xi32> to vector<32x128xi32>
    %63 = arith.cmpi eq, %34, %62 : vector<32x128xi32>
    %cst_21 = arith.constant 0.000000e+00 : f32
    %64 = vector.shape_cast %53 : vector<1x128xf32> to vector<1x128xf32>
    %65 = vector.broadcast %64 : vector<1x128xf32> to vector<32x128xf32>
    %66 = vector.broadcast %cst_21 : f32 to vector<32x128xf32>
    %67 = arith.select %63, %65, %66 : vector<32x128xi1>, vector<32x128xf32>
    %cst_22 = arith.constant dense<0.000000e+00> : vector<32xf32>
    %68 = vector.multi_reduction <add>, %67, %cst_22 [1] : vector<32x128xf32> to vector<32xf32>
    %69 = vector.shape_cast %68 : vector<32xf32> to vector<32x1xf32>
    %70 = arith.mulf %0, %0 : vector<32x128xf32>
    %cst_23 = arith.constant dense<0.000000e+00> : vector<32xf32>
    %71 = vector.multi_reduction <add>, %70, %cst_23 [1] : vector<32x128xf32> to vector<32xf32>
    %72 = vector.shape_cast %71 : vector<32xf32> to vector<32x1xf32>
    %cst_24 = arith.constant dense<0.000000e+00> : vector<32xf32>
    %73 = vector.multi_reduction <add>, %0, %cst_24 [1] : vector<32x128xf32> to vector<32xf32>
    %74 = vector.shape_cast %73 : vector<32xf32> to vector<32x1xf32>
    %cst_25 = arith.constant 2.000000e+00 : f32
    %cst_26 = arith.constant 9.99999997E-7 : f32
    %75 = arith.mulf %cst_25, %cst_26 : f32
    %76 = vector.broadcast %75 : f32 to vector<32x1xf32>
    %77 = arith.mulf %76, %74 : vector<32x1xf32>
    %78 = arith.addf %72, %77 : vector<32x1xf32>
    %cst_27 = arith.constant 2.000000e+00 : f32
    %79 = vector.broadcast %cst_27 : f32 to vector<32x1xf32>
    %80 = arith.mulf %79, %5 : vector<32x1xf32>
    %81 = arith.subf %78, %80 : vector<32x1xf32>
    %82 = arith.addf %81, %61 : vector<32x1xf32>
    %cst_28 = arith.constant 0.000000e+00 : f32
    %83 = vector.broadcast %cst_28 : f32 to vector<32x1xf32>
    %84 = arith.maximumf %82, %83 : vector<32x1xf32>
    %85 = math.sqrt %84 : vector<32x1xf32>
    %cst_29 = arith.constant 2.000000e+00 : f32
    %86 = vector.broadcast %cst_29 : f32 to vector<32x1xf32>
    %87 = arith.mulf %86, %46 : vector<32x1xf32>
    %88 = arith.subf %78, %87 : vector<32x1xf32>
    %89 = arith.addf %88, %69 : vector<32x1xf32>
    %cst_30 = arith.constant 0.000000e+00 : f32
    %90 = vector.broadcast %cst_30 : f32 to vector<32x1xf32>
    %91 = arith.maximumf %89, %90 : vector<32x1xf32>
    %92 = math.sqrt %91 : vector<32x1xf32>
    %93 = arith.subf %85, %92 : vector<32x1xf32>
    %cst_31 = arith.constant 1.000000e+00 : f32
    %94 = vector.broadcast %cst_31 : f32 to vector<32x1xf32>
    %95 = arith.addf %93, %94 : vector<32x1xf32>
    %cst_32 = arith.constant 0.000000e+00 : f32
    %96 = vector.broadcast %cst_32 : f32 to vector<32x1xf32>
    %97 = arith.maximumf %95, %96 : vector<32x1xf32>
    %cst_33 = arith.constant 0.000000e+00 : f32
    %98 = vector.broadcast %cst_33 : f32 to vector<32x1xf32>
    %99 = arith.select %23, %97, %98 : vector<32x1xi1>, vector<32x1xf32>
    %100 = vector.shape_cast %99 : vector<32x1xf32> to vector<1x32x1xf32>
    %cst_34 = arith.constant dense<0.000000e+00> : vector<1xf32>
    %101 = vector.multi_reduction <add>, %100, %cst_34 [1, 2] : vector<1x32x1xf32> to vector<1xf32>
    %102 = vector.shape_cast %101 : vector<1xf32> to vector<1x1x1xf32>
    %103 = vector.extract %102[0, 0, 0] : f32 from vector<1x1x1xf32>
    %104 = vector.broadcast %33 : f32 to vector<1x8x128xf32>
    %c0_35 = arith.constant 0 : index
    %c0_36 = arith.constant 0 : index
    %c0_37 = arith.constant 0 : index
    %105 = vector.load %arg5[%c0_35, %c0_36, %c0_37] : memref<1x8x128xf32, #tpu.memory_space<vmem>>, vector<1x8x128xf32>
    tpu.vector_store %arg5[%c0_35, %c0_36, %c0_37], %104 {strides = array<i32>} : memref<1x8x128xf32, #tpu.memory_space<vmem>>, vector<1x8x128xf32>,
    %106 = vector.broadcast %103 : f32 to vector<1x8x128xf32>
    %c0_38 = arith.constant 0 : index
    %c0_39 = arith.constant 0 : index
    %c0_40 = arith.constant 0 : index
    %107 = vector.load %arg6[%c0_38, %c0_39, %c0_40] : memref<1x8x128xf32, #tpu.memory_space<vmem>>, vector<1x8x128xf32>
    tpu.vector_store %arg6[%c0_38, %c0_39, %c0_40], %106 {strides = array<i32>} : memref<1x8x128xf32, #tpu.memory_space<vmem>>, vector<1x8x128xf32>,
    return
  }
  func.func @transform_0(%arg0: i32) -> (i32, i32) {
    %c0_i32 = arith.constant 0 : i32
    %c0_i32_0 = arith.constant 0 : i32
    return %arg0, %c0_i32 : i32, i32
  }
  func.func @transform_1(%arg0: i32) -> (i32, i32) {
    %c0_i32 = arith.constant 0 : i32
    %c0_i32_0 = arith.constant 0 : i32
    %c0_i32_1 = arith.constant 0 : i32
    return %c0_i32, %c0_i32_0 : i32, i32
  }
  func.func @transform_2(%arg0: i32) -> (i32, i32) {
    %c0_i32 = arith.constant 0 : i32
    %c0_i32_0 = arith.constant 0 : i32
    %c0_i32_1 = arith.constant 0 : i32
    return %c0_i32, %c0_i32_0 : i32, i32
  }
  func.func @transform_3(%arg0: i32) -> (i32, i32) {
    %c0_i32 = arith.constant 0 : i32
    %c0_i32_0 = arith.constant 0 : i32
    return %arg0, %c0_i32 : i32, i32
  }
  func.func @transform_4(%arg0: i32) -> (i32, i32, i32) {
    %c0_i32 = arith.constant 0 : i32
    %c0_i32_0 = arith.constant 0 : i32
    %c0_i32_1 = arith.constant 0 : i32
    return %arg0, %c0_i32, %c0_i32_0 : i32, i32, i32
  }
  func.func @transform_5(%arg0: i32) -> (i32, i32, i32) {
    %c0_i32 = arith.constant 0 : i32
    %c0_i32_0 = arith.constant 0 : i32
    %c0_i32_1 = arith.constant 0 : i32
    return %arg0, %c0_i32, %c0_i32_0 : i32, i32, i32
  }
}

</mosaic_0001>

<bundles_post_ra>
// kernel: tpu_custom_call.1
= control target key start
LH: loop header
LB: loop body
LE: loop exit
PB: predicated region body
PF: predicated region fallthrough
CT: control target
= control target key end

     0   :  { %11 = vsyncpa [#allocation3], 0  ;;  %s1255_s0 = inlined_call_operand.hbm [shape: f32[32,128], index: 0, kind: input, shape index: {}]   ;;  %s1256_s1 = inlined_call_operand.hbm [shape: bf16[128,128], index: 1, kind: input, shape index: {}]   ;;  %s1257_s2 = inlined_call_operand.vmem [shape: f32[1,128], index: 2, kind: input, shape index: {}]   ;;  %s1258_s3 = inlined_call_operand.hbm [shape: f32[32,256], index: 3, kind: output, shape index: {0}]   ;;  %s1259_s4 = inlined_call_operand.hbm [shape: f32[1,8,128], index: 4, kind: output, shape index: {1}]   ;;  %s1260_s5 = inlined_call_operand.hbm [shape: f32[1,8,128], index: 5, kind: output, shape index: {2}]  }
   0x1   :  { %12 = vsyncpa [#allocation6], 0 }
   0x2   :  { %13 = vsyncpa [#allocation4], 0 }
   0x3   :  { %14 = vsyncpa [#allocation9], 0  ;;  %s930_s18 = smov [#allocation2]   ;;  %s812_s22 = scalar_lea.hbm %s1255_s0, 512 }
   0x4   :  { %s20_s19 = sshll.u32 %s930_s18, 4  ;;  %p813_p0 = scmp.ne.s32.totalorder %s1255_s0, %s812_s22  ;;  %s21_s19 = int_to_ptr.vmem [resolvable:$true] %s20_s19 }
   0x5   :  { %p816_p1 = scmp.lt.u32.totalorder %s812_s22, %s1255_s0 }
   0x7   :  { %p818_p2 = pnand %p816_p1, %p813_p0 }
   0x9   :  { %821 = shalt.err (!%p818_p2)
}
   0xa   :  { %s822_s27 = scalar_lea.vmem %s21_s19, 512  ;;  %p827_p4 = scmp.lt.s32.totalorder %s21_s19, %s21_s19 }
   0xb   :  { %p823_p3 = scmp.ne.s32.totalorder %s21_s19, %s822_s27  ;;  %p828_p5 = scmp.lt.s32.totalorder %s822_s27, %s822_s27 }
   0xd   :  { %p829_p6 = por %p828_p5, %p827_p4 }
   0xf   :  { %p830_p7 = pnand %p829_p6, %p823_p3 }
  0x11   :  { %833 = shalt.err (!%p830_p7)
}
  0x12   :  { %s931_s28 = smov 128   ;;  %s932_s29 = smov 8  }
  0x13   :  { %26 = dma.hbm_to_vmem [thread:$0]  %s1255_s0, 512, %s21_s19, [#allocation3], %s931_s28, %s931_s28, %s932_s29  }
  0x14   :  { %s933_s7 = smov [#allocation5]   ;;  %s834_s11 = scalar_lea.hbm %s1256_s1, 1024 }
  0x15   :  { %s32_s8 = sshll.u32 %s933_s7, 4  ;;  %p835_p8 = scmp.ne.s32.totalorder %s1256_s1, %s834_s11  ;;  %s33_s8 = int_to_ptr.vmem [resolvable:$true] %s32_s8 }
  0x16   :  { %p838_p9 = scmp.lt.u32.totalorder %s834_s11, %s1256_s1 }
  0x18   :  { %p840_p10 = pnand %p838_p9, %p835_p8 }
  0x1a   :  { %843 = shalt.err (!%p840_p10)
}
  0x1b   :  { %s844_s16 = scalar_lea.vmem %s33_s8, 1024  ;;  %p849_p12 = scmp.lt.s32.totalorder %s33_s8, %s33_s8 }
  0x1c   :  { %p845_p11 = scmp.ne.s32.totalorder %s33_s8, %s844_s16  ;;  %p850_p13 = scmp.lt.s32.totalorder %s844_s16, %s844_s16 }
  0x1e   :  { %p851_p0 = por %p850_p13, %p849_p12 }
  0x20   :  { %p852_p1 = pnand %p851_p0, %p845_p11 }
  0x22   :  { %855 = shalt.err (!%p852_p1)
}
  0x23   :  { %s934_s0 = smov 64   ;;  %s935_s17 = smov 4  }
  0x24   :  { %38 = dma.hbm_to_vmem [thread:$0]  %s1256_s1, 1024, %s33_s8, [#allocation6], %s934_s0, %s934_s0, %s935_s17  }
  0x25   :  { %922 = dma.done.wait [#allocation3], 512  }
  0x26   :  { %923 = vsyncadd [#allocation3], 4294966784 }
  0x27   :  { %924 = dma.done.wait [#allocation6], 1024  }
  0x28   :  { %925 = vsyncadd [#allocation6], 4294966272  ;;  %v772_v0 = vld [vmem:[#allocation5] sm:$0xff]   ;;  %v773_v1 = vld [vmem:[#allocation5 + $0x8] sm:$0xff]   ;;  %v309_v18 = vlaneseq  ;;  %s936_s21 = smov [#allocation8]   ;;  %s937_s23 = smov [#allocation7]  }
  0x29   :  { %717 = vmatprep.subr.bf16.mxu0 %v772_v0  ;;  %737 = vmatprep.subr.bf16.mxu1 %v772_v0  ;;  %v774_v2 = vld [vmem:[#allocation5 + $0x10] sm:$0xff]   ;;  %v995_v3 = vld [vmem:[#allocation2] sm:$0xff]  ;;  %v997_v4 = vld [vmem:[#allocation2 + $0x8] sm:$0xff]  ;;  %s661_s22 = sshll.u32 %s936_s21, 4  ;;  %s648_s24 = sshll.u32 %s937_s23, 4  ;;  %s662_s22 = int_to_ptr.vmem [resolvable:$true] %s661_s22  ;;  %s1212_s24 = int_to_ptr.vmem [resolvable:$true] %s648_s24 }
  0x2a   :  { %718 = vmatpush3.bf16.xpose.msra.mxu0 %v772_v0  ;;  %738 = vmatpush3.bf16.msra.mxu1 %v772_v0  ;;  %v999_v5 = vld [vmem:[#allocation2 + $0x10] sm:$0xff]  ;;  %v52_v6 = vpack.c.bf16 %v997_v4, %v995_v3  ;;  %254 = vst [vmem:[#allocation7] sm:$0xff] %v995_v3  ;;  %255 = vst [vmem:[#allocation7 + $0x10] sm:$0xff] %v997_v4  ;;  %v1005_v7 = vld [vmem:[#allocation2 + $0x18] sm:$0xff]  ;;  %v1023_v19 = vand.u32 127, %v309_v18  ;;  %s856_s25 = scalar_lea.vmem %s662_s22, 128  ;;  %p861_p3 = scmp.lt.s32.totalorder %s662_s22, %s662_s22 }
  0x2b   :  { %719 = vmatprep.subr.bf16.mxu0 %v773_v1  ;;  %739 = vmatprep.subr.bf16.mxu1 %v773_v1  ;;  %256 = vst [vmem:[#allocation7 + $0x20] sm:$0xff] %v999_v5  ;;  %257 = vst [vmem:[#allocation7 + $0x30] sm:$0xff] %v1005_v7  ;;  %v775_v8 = vld [vmem:[#allocation5 + $0x18] sm:$0xff]   ;;  %v776_v9 = vld [vmem:[#allocation5 + $0x20] sm:$0xff]   ;;  %v53_v13 = vpack.c.bf16 %v1005_v7, %v999_v5  ;;  %p857_p2 = scmp.ne.s32.totalorder %s662_s22, %s856_s25  ;;  %p862_p4 = scmp.lt.s32.totalorder %s856_s25, %s856_s25 }
  0x2c   :  { %733 = vmatprep.mubr.bf16.mxu0 %v52_v6  ;;  %v777_v10 = vld [vmem:[#allocation5 + $0x28] sm:$0xff]   ;;  %v778_v11 = vld [vmem:[#allocation5 + $0x30] sm:$0xff]   ;;  %v779_v12 = vld [vmem:[#allocation5 + $0x38] sm:$0xff]  }
  0x2d   :  { %p863_p5 = por %p862_p4, %p861_p3 }
  0x2e   :  { %740 = vmatpush3.bf16.msra.mxu1 %v773_v1 }
  0x2f   :  { %741 = vmatprep.subr.bf16.mxu1 %v774_v2  ;;  %p864_p6 = pnand %p863_p5, %p857_p2 }
  0x32   :  { %720 = vmatpush3.bf16.xpose.msra.mxu0 %v773_v1  ;;  %742 = vmatpush3.bf16.msra.mxu1 %v774_v2 }
  0x33   :  { %721 = vmatprep.subr.bf16.mxu0 %v774_v2  ;;  %743 = vmatprep.subr.bf16.mxu1 %v775_v8 }
  0x36   :  { %744 = vmatpush3.bf16.msra.mxu1 %v775_v8 }
  0x37   :  { %745 = vmatprep.subr.bf16.mxu1 %v776_v9 }
  0x3a   :  { %722 = vmatpush3.bf16.xpose.msra.mxu0 %v774_v2  ;;  %746 = vmatpush3.bf16.msra.mxu1 %v776_v9 }
  0x3b   :  { %723 = vmatprep.subr.bf16.mxu0 %v775_v8  ;;  %747 = vmatprep.subr.bf16.mxu1 %v777_v10 }
  0x3e   :  { %748 = vmatpush3.bf16.msra.mxu1 %v777_v10 }
  0x3f   :  { %749 = vmatprep.subr.bf16.mxu1 %v778_v11 }
  0x42   :  { %724 = vmatpush3.bf16.xpose.msra.mxu0 %v775_v8  ;;  %750 = vmatpush3.bf16.msra.mxu1 %v778_v11 }
  0x43   :  { %725 = vmatprep.subr.bf16.mxu0 %v776_v9  ;;  %751 = vmatprep.subr.bf16.mxu1 %v779_v12 }
  0x46   :  { %752 = vmatpush3.bf16.msra.mxu1 %v779_v12 }
  0x4a   :  { %726 = vmatpush3.bf16.xpose.msra.mxu0 %v776_v9 }
  0x4b   :  { %727 = vmatprep.subr.bf16.mxu0 %v777_v10 }
  0x52   :  { %728 = vmatpush3.bf16.xpose.msra.mxu0 %v777_v10 }
  0x53   :  { %729 = vmatprep.subr.bf16.mxu0 %v778_v11 }
  0x5a   :  { %730 = vmatpush3.bf16.xpose.msra.mxu0 %v778_v11 }
  0x5b   :  { %731 = vmatprep.subr.bf16.mxu0 %v779_v12 }
  0x62   :  { %732 = vmatpush3.bf16.xpose.msra.mxu0 %v779_v12 }
  0x69   :  { %734 = vmatmul.mubr.bf16.vlgmr.msra.gmra.mrb[0].mxu0 %v53_v13 }
 0x13c   :  { %v1011_v14 = vpop.f32.mrb[0].mxu0 }
 0x13d   :  { %171 = vmax.xlane.f32.xlu1 %v1011_v14  ;;  %v1014_v15 = vpop.f32.mrb[1].mxu0 }
 0x13e   :  { %167 = vmax.xlane.f32.xlu0 %v1014_v15  ;;  %v1017_v16 = vpop.f32.mrb[2].mxu0 }
 0x13f   :  { %v1019_v17 = vpop.f32.mrb[3].mxu0 }
 0x141   :  { %173 = vmax.xlane.f32.xlu1 %v1017_v16 }
 0x142   :  { %169 = vmax.xlane.f32.xlu0 %v1019_v17 }
 0x1ca   :  { %v1025_v20 = vpop.xlane.xlu1 %171 }
 0x1cb   :  { %v177_v21 = vsub.f32 %v1011_v14, %v1025_v20  ;;  %vm313_vm0 = vcmp.eq.f32.partialorder %v1011_v14, %v1025_v20  ;;  %v1031_v22 = vpop.xlane.xlu0 %167 }
 0x1cc   :  { %v175_v23 = vsub.f32 %v1014_v15, %v1031_v22  ;;  %vm311_vm1 = vcmp.eq.f32.partialorder %v1014_v15, %v1031_v22  ;;  %v317_v27 = vsel %vm313_vm0, %v1023_v19, 128 }
 0x1cd   :  { %v315_v24 = vsel %vm311_vm1, %v1023_v19, 128  ;;  %v348_v30 = vshra.s32 %v317_v27, 16  ;;  %v347_v42 = vand.u32 65535, %v317_v27 }
 0x1ce   :  { %v1038_v25 = vpop.xlane.xlu1 %173  ;;  %v320_v26 = vshra.s32 %v315_v24, 16  ;;  %v319_v38 = vand.u32 65535, %v315_v24 }
 0x1cf   :  { %vm314_vm2 = vcmp.eq.f32.partialorder %v1017_v16, %v1038_v25  ;;  %v1043_v28 = vpop.xlane.xlu0 %169  ;;  %v350_v36 = vcvt.s32.f32 %v348_v30  ;;  %v349_v48 = vcvt.s32.f32 %v347_v42 }
 0x1d0   :  { %vm312_vm3 = vcmp.eq.f32.partialorder %v1019_v17, %v1043_v28  ;;  %v322_v29 = vcvt.s32.f32 %v320_v26  ;;  %v318_v33 = vsel %vm314_vm2, %v1023_v19, 128  ;;  %v321_v41 = vcvt.s32.f32 %v319_v38 }
 0x1d1   :  { %v316_v31 = vsel %vm312_vm3, %v1023_v19, 128  ;;  %v362_v35 = vshra.s32 %v318_v33, 16  ;;  %v361_v46 = vand.u32 65535, %v318_v33 }
 0x1d2   :  { %v334_v32 = vshra.s32 %v316_v31, 16  ;;  %323 = vmin.xlane.f32.xlu0 %v322_v29  ;;  %v333_v39 = vand.u32 65535, %v316_v31 }
 0x1d3   :  { %v364_v37 = vcvt.s32.f32 %v362_v35  ;;  %v363_v52 = vcvt.s32.f32 %v361_v46  ;;  %v179_v46 = vmul.f32 1.442695, %v175_v23 }
 0x1d4   :  { %v336_v34 = vcvt.s32.f32 %v334_v32  ;;  %v335_v45 = vcvt.s32.f32 %v333_v39 }
 0x1d5   :  { %780 = vpow2.f32 %v179_v46 }
 0x1d6   :  { %337 = vmin.xlane.f32.xlu1 %v336_v34  ;;  %351 = vmin.xlane.f32.xlu0 %v350_v36 }
 0x1da   :  { %365 = vmin.xlane.f32.xlu1 %v364_v37 }
 0x25f   :  { %v324_v40 = vpop.xlane.xlu0 %323 }
 0x260   :  { %vm325_vm4 = vcmp.eq.f32.partialorder %v322_v29, %v324_v40  ;;  %v330_v54 = vcvt.f32.s32 %v324_v40 }
 0x261   :  { %v326_v43 = vsel %vm325_vm4, %v321_v41, inf }
 0x262   :  { %327 = vmin.xlane.f32.xlu0 %v326_v43  ;;  %v331_v57 = vshll.u32 %v330_v54, 16 }
 0x263   :  { %v338_v44 = vpop.xlane.xlu1 %337  ;;  %v352_v47 = vpop.xlane.xlu0 %351 }
 0x264   :  { %vm339_vm5 = vcmp.eq.f32.partialorder %v336_v34, %v338_v44  ;;  %vm353_vm6 = vcmp.eq.f32.partialorder %v350_v36, %v352_v47  ;;  %v344_v55 = vcvt.f32.s32 %v338_v44  ;;  %v358_v58 = vcvt.f32.s32 %v352_v47 }
 0x265   :  { %v340_v49 = vsel %vm339_vm5, %v335_v45, inf  ;;  %v354_v50 = vsel %vm353_vm6, %v349_v48, inf  ;;  %v176_v45 = vsub.f32 %v1019_v17, %v1043_v28  ;;  %v178_v48 = vsub.f32 %v1017_v16, %v1038_v25 }
 0x266   :  { %341 = vmin.xlane.f32.xlu1 %v340_v49  ;;  %355 = vmin.xlane.f32.xlu0 %v354_v50  ;;  %v345_v62 = vshll.u32 %v344_v55, 16  ;;  %v359_v2 = vshll.u32 %v358_v58, 16 }
 0x267   :  { %v366_v51 = vpop.xlane.xlu1 %365  ;;  %v181_v49 = vmul.f32 1.442695, %v176_v45  ;;  %v185_v55 = vmul.f32 1.442695, %v178_v48 }
 0x268   :  { %vm367_vm7 = vcmp.eq.f32.partialorder %v364_v37, %v366_v51  ;;  %v372_v63 = vcvt.f32.s32 %v366_v51  ;;  %v183_v51 = vmul.f32 1.442695, %v177_v21 }
 0x269   :  { %v368_v53 = vsel %vm367_vm7, %v363_v52, inf  ;;  %782 = vpow2.f32 %v181_v49 }
 0x26a   :  { %369 = vmin.xlane.f32.xlu1 %v368_v53  ;;  %v373_v12 = vshll.u32 %v372_v63, 16  ;;  %784 = vpow2.f32 %v183_v51 }
 0x26b   :  { %786 = vpow2.f32 %v185_v55 }
 0x2ef   :  { %v328_v56 = vpop.xlane.xlu0 %327 }
 0x2f0   :  { %v329_v59 = vcvt.f32.s32 %v328_v56 }
 0x2f2   :  { %v1049_v60 = vadd.s32 %v331_v57, %v329_v59 }
 0x2f3   :  { %v342_v61 = vpop.xlane.xlu1 %341  ;;  %v356_v1 = vpop.xlane.xlu0 %355 }
 0x2f4   :  { %v343_v0 = vcvt.f32.s32 %v342_v61  ;;  %v357_v6 = vcvt.f32.s32 %v356_v1  ;;  %vm375_vm8 = vcmp.eq.s32.totalorder %v1023_v19, %v1049_v60 }
 0x2f5   :  { %v379_v9 = vsel %vm375_vm8, -inf, %v1014_v15 }
 0x2f6   :  { %v1053_v8 = vadd.s32 %v345_v62, %v343_v0  ;;  %v1059_v10 = vadd.s32 %v359_v2, %v357_v6  ;;  %383 = vmax.xlane.f32.xlu0 %v379_v9  ;;  %v1107_v62 = vpop.eup %780  ;;  %v490_v2 = vmul.f32 %v995_v3, %v995_v3  ;;  %v491_v6 = vmul.f32 %v997_v4, %v997_v4 }
 0x2f7   :  { %v370_v11 = vpop.xlane.xlu1 %369  ;;  %v1110_v63 = vpop.eup %782 }
 0x2f8   :  { %v371_v13 = vcvt.f32.s32 %v370_v11  ;;  %vm376_vm9 = vcmp.eq.s32.totalorder %v1023_v19, %v1053_v8  ;;  %vm377_vm10 = vcmp.eq.s32.totalorder %v1023_v19, %v1059_v10  ;;  %v1112_v0 = vpop.eup %784  ;;  %v696_v11 = vld [vmem:[%s1257_s2] ss:$0 sm:$0xff] }
 0x2f9   :  { %v380_v18 = vsel %vm376_vm9, -inf, %v1019_v17  ;;  %v381_v26 = vsel %vm377_vm10, -inf, %v1011_v14  ;;  %v1116_v1 = vpop.eup %786 }
 0x2fa   :  { %v1069_v24 = vadd.s32 %v373_v12, %v371_v13  ;;  %385 = vmax.xlane.f32.xlu1 %v380_v18  ;;  %387 = vmax.xlane.f32.xlu0 %v381_v26  ;;  %v462_v12 = vsel %vm375_vm8, %v696_v11, 0.0  ;;  %v463_v13 = vsel %vm376_vm9, %v696_v11, 0.0 }
 0x2fc   :  { %vm378_vm11 = vcmp.eq.s32.totalorder %v1023_v19, %v1069_v24 }
 0x2fd   :  { %v382_v27 = vsel %vm378_vm11, -inf, %v1017_v16 }
 0x2fe   :  { %389 = vmax.xlane.f32.xlu1 %v382_v27 }
 0x383   :  { %v1081_v29 = vpop.xlane.xlu0 %383 }
 0x384   :  { %vm391_vm12 = vcmp.eq.f32.partialorder %v379_v9, %v1081_v29  ;;  %v492_v9 = vmul.f32 %v999_v5, %v999_v5 }
 0x385   :  { %v395_v30 = vsel %vm391_vm12, %v1023_v19, 128 }
 0x386   :  { %v400_v32 = vshra.s32 %v395_v30, 16  ;;  %v399_v47 = vand.u32 65535, %v395_v30 }
 0x387   :  { %v1085_v31 = vpop.xlane.xlu1 %385  ;;  %v1088_v33 = vpop.xlane.xlu0 %387 }
 0x388   :  { %vm392_vm13 = vcmp.eq.f32.partialorder %v380_v18, %v1085_v31  ;;  %vm393_vm14 = vcmp.eq.f32.partialorder %v381_v26, %v1088_v33  ;;  %v402_v35 = vcvt.s32.f32 %v400_v32  ;;  %v401_v53 = vcvt.s32.f32 %v399_v47 }
 0x389   :  { %v396_v34 = vsel %vm392_vm13, %v1023_v19, 128  ;;  %v397_v36 = vsel %vm393_vm14, %v1023_v19, 128  ;;  %v493_v18 = vmul.f32 %v1005_v7, %v1005_v7  ;;  %v464_v26 = vsel %vm377_vm10, %v696_v11, 0.0 }
 0x38a   :  { %v414_v37 = vshra.s32 %v396_v34, 16  ;;  %403 = vmin.xlane.f32.xlu0 %v402_v35  ;;  %v428_v39 = vshra.s32 %v397_v36, 16  ;;  %v413_v50 = vand.u32 65535, %v396_v34  ;;  %v427_v54 = vand.u32 65535, %v397_v36 }
 0x38b   :  { %v1093_v38 = vpop.xlane.xlu1 %389 }
 0x38c   :  { %vm394_vm15 = vcmp.eq.f32.partialorder %v382_v27, %v1093_v38  ;;  %v416_v40 = vcvt.s32.f32 %v414_v37  ;;  %v430_v42 = vcvt.s32.f32 %v428_v39  ;;  %v415_v23 = vcvt.s32.f32 %v413_v50 }
 0x38d   :  { %v398_v41 = vsel %vm394_vm15, %v1023_v19, 128  ;;  %v429_v57 = vcvt.s32.f32 %v427_v54  ;;  %v465_v54 = vsel %vm378_vm11, %v696_v11, 0.0 }
 0x38e   :  { %417 = vmin.xlane.f32.xlu1 %v416_v40  ;;  %v442_v43 = vshra.s32 %v398_v41, 16  ;;  %431 = vmin.xlane.f32.xlu0 %v430_v42  ;;  %v441_v56 = vand.u32 65535, %v398_v41 }
 0x390   :  { %v444_v44 = vcvt.s32.f32 %v442_v43  ;;  %v443_v59 = vcvt.s32.f32 %v441_v56 }
 0x392   :  { %445 = vmin.xlane.f32.xlu1 %v444_v44 }
 0x417   :  { %v404_v52 = vpop.xlane.xlu0 %403 }
 0x418   :  { %vm405_vm0 = vcmp.eq.f32.partialorder %v402_v35, %v404_v52  ;;  %v410_v32 = vcvt.f32.s32 %v404_v52 }
 0x419   :  { %v406_v17 = vsel %vm405_vm0, %v401_v53, inf }
 0x41a   :  { %407 = vmin.xlane.f32.xlu0 %v406_v17  ;;  %v411_v39 = vshll.u32 %v410_v32, 16 }
 0x41b   :  { %v418_v15 = vpop.xlane.xlu1 %417  ;;  %v432_v16 = vpop.xlane.xlu0 %431 }
 0x41c   :  { %vm419_vm1 = vcmp.eq.f32.partialorder %v416_v40, %v418_v15  ;;  %vm433_vm2 = vcmp.eq.f32.partialorder %v430_v42, %v432_v16  ;;  %v424_v27 = vcvt.f32.s32 %v418_v15  ;;  %v438_v60 = vcvt.f32.s32 %v432_v16 }
 0x41d   :  { %v420_v58 = vsel %vm419_vm1, %v415_v23, inf  ;;  %v434_v14 = vsel %vm433_vm2, %v429_v57, inf }
 0x41e   :  { %421 = vmin.xlane.f32.xlu1 %v420_v58  ;;  %435 = vmin.xlane.f32.xlu0 %v434_v14  ;;  %v425_v36 = vshll.u32 %v424_v27, 16  ;;  %v439_v40 = vshll.u32 %v438_v60, 16 }
 0x41f   :  { %v446_v21 = vpop.xlane.xlu1 %445 }
 0x420   :  { %vm447_vm3 = vcmp.eq.f32.partialorder %v444_v44, %v446_v21  ;;  %v452_v41 = vcvt.f32.s32 %v446_v21 }
 0x421   :  { %v448_v61 = vsel %vm447_vm3, %v443_v59, inf }
 0x422   :  { %449 = vmin.xlane.f32.xlu1 %v448_v61  ;;  %187 = vadd.xlane.f32.xlu0 %v1107_v62  ;;  %v453_v48 = vshll.u32 %v452_v41, 16 }
 0x426   :  { %189 = vadd.xlane.f32.xlu1 %v1110_v63  ;;  %191 = vadd.xlane.f32.xlu0 %v1112_v0 }
 0x42a   :  { %193 = vadd.xlane.f32.xlu1 %v1116_v1  ;;  %502 = vadd.xlane.f32.xlu0 %v995_v3 }
 0x42e   :  { %504 = vadd.xlane.f32.xlu1 %v997_v4  ;;  %494 = vadd.xlane.f32.xlu0 %v490_v2 }
 0x432   :  { %496 = vadd.xlane.f32.xlu1 %v491_v6  ;;  %506 = vadd.xlane.f32.xlu0 %v999_v5 }
 0x436   :  { %498 = vadd.xlane.f32.xlu1 %v492_v9  ;;  %508 = vadd.xlane.f32.xlu0 %v1005_v7 }
 0x43a   :  { %466 = vadd.xlane.f32.xlu1 %v462_v12  ;;  %468 = vadd.xlane.f32.xlu0 %v463_v13 }
 0x43e   :  { %500 = vadd.xlane.f32.xlu1 %v493_v18  ;;  %470 = vadd.xlane.f32.xlu0 %v464_v26 }
 0x4a7   :  { %v408_v30 = vpop.xlane.xlu0 %407 }
 0x4a8   :  { %v409_v34 = vcvt.f32.s32 %v408_v30 }
 0x4aa   :  { %v412_v44 = vadd.s32 %v411_v39, %v409_v34 }
 0x4ab   :  { %v422_v35 = vpop.xlane.xlu1 %421  ;;  %v436_v8 = vpop.xlane.xlu0 %435 }
 0x4ac   :  { %v423_v37 = vcvt.f32.s32 %v422_v35  ;;  %v437_v42 = vcvt.f32.s32 %v436_v8  ;;  %vm474_vm6 = vcmp.eq.s32.totalorder %v1023_v19, %v412_v44  ;;  %v520_v8 = vmul.f32 2.0, %v1025_v20 }
 0x4ad   :  { %v478_v17 = vsel %vm474_vm6, %v696_v11, 0.0  ;;  %v518_v44 = vmul.f32 2.0, %v1031_v22  ;;  %v564_v20 = vmul.f32 2.0, %v1088_v33 }
 0x4ae   :  { %v426_v43 = vadd.s32 %v425_v36, %v423_v37  ;;  %v440_v45 = vadd.s32 %v439_v40, %v437_v42  ;;  %v519_v37 = vmul.f32 2.0, %v1043_v28  ;;  %v563_v28 = vmul.f32 2.0, %v1085_v31 }
 0x4af   :  { %v450_v46 = vpop.xlane.xlu1 %449  ;;  %v188_v47 = vpop.xlane.xlu0 %187 }
 0x4b0   :  { %v451_v10 = vcvt.f32.s32 %v450_v46  ;;  %vm475_vm4 = vcmp.eq.s32.totalorder %v1023_v19, %v426_v43  ;;  %788 = vrcp.f32 %v188_v47  ;;  %vm476_vm5 = vcmp.eq.s32.totalorder %v1023_v19, %v440_v45 }
 0x4b1   :  { %v479_v49 = vsel %vm475_vm4, %v696_v11, 0.0  ;;  %v480_v50 = vsel %vm476_vm5, %v696_v11, 0.0 }
 0x4b2   :  { %484 = vadd.xlane.f32.xlu0 %v479_v49  ;;  %v454_v51 = vadd.s32 %v453_v48, %v451_v10  ;;  %486 = vadd.xlane.f32.xlu1 %v480_v50 }
 0x4b3   :  { %v190_v52 = vpop.xlane.xlu1 %189  ;;  %v192_v53 = vpop.xlane.xlu0 %191 }
 0x4b4   :  { %790 = vrcp.f32 %v190_v52  ;;  %vm477_vm7 = vcmp.eq.s32.totalorder %v1023_v19, %v454_v51 }
 0x4b5   :  { %792 = vrcp.f32 %v192_v53  ;;  %v481_v15 = vsel %vm477_vm7, %v696_v11, 0.0 }
 0x4b6   :  { %472 = vadd.xlane.f32.xlu0 %v465_v54  ;;  %482 = vadd.xlane.f32.xlu1 %v478_v17 }
 0x4b7   :  { %v194_v55 = vpop.xlane.xlu1 %193  ;;  %v503_v18 = vpop.xlane.xlu0 %502 }
 0x4b8   :  { %794 = vrcp.f32 %v194_v55  ;;  %v510_v35 = vmul.f32 2e-06, %v503_v18  ;;  %v521_v55 = vmul.f32 2.0, %v1038_v25 }
 0x4ba   :  { %v789_v23 = vpop.eup %788  ;;  %488 = vadd.xlane.f32.xlu1 %v481_v15 }
 0x4bb   :  { %v199_v56 = vmul.f32 %v789_v23, %v1107_v62  ;;  %v505_v26 = vpop.xlane.xlu1 %504 }
 0x4bc   :  { %v511_v32 = vmul.f32 2e-06, %v505_v26 }
 0x4bd   :  { %v277_v14 = vsub.f32 %v995_v3, %v199_v56 }
 0x4be   :  { %v791_v16 = vpop.eup %790 }
 0x4bf   :  { %v793_v57 = vpop.eup %792  ;;  %v200_v58 = vmul.f32 %v791_v16, %v1110_v63  ;;  %v281_v2 = vmul.f32 %v277_v14, %v277_v14 }
 0x4c0   :  { %v201_v24 = vmul.f32 %v793_v57, %v1112_v0 }
 0x4c1   :  { %v203_v21 = vpack.c.bf16 %v200_v58, %v199_v56  ;;  %v278_v59 = vsub.f32 %v997_v4, %v200_v58  ;;  %v495_v4 = vpop.xlane.xlu0 %494  ;;  %v562_v56 = vmul.f32 2.0, %v1081_v29 }
 0x4c2   :  { %v795_v61 = vpop.eup %794  ;;  %v279_v19 = vsub.f32 %v999_v5, %v201_v24  ;;  %v497_v5 = vpop.xlane.xlu1 %496  ;;  %v514_v39 = vadd.f32 %v510_v35, %v495_v4 }
 0x4c3   :  { %753 = vmatprep.mubr.bf16.mxu1 %v203_v21  ;;  %v282_v6 = vmul.f32 %v278_v59, %v278_v59  ;;  %v202_v9 = vmul.f32 %v795_v61, %v1116_v1  ;;  %v515_v36 = vadd.f32 %v511_v32, %v497_v5  ;;  %v565_v59 = vmul.f32 2.0, %v1093_v38 }
 0x4c4   :  { %v283_v12 = vmul.f32 %v279_v19, %v279_v19  ;;  %v522_v10 = vsub.f32 %v514_v39, %v518_v44  ;;  %v566_v58 = vsub.f32 %v514_v39, %v562_v56 }
 0x4c5   :  { %v204_v62 = vpack.c.bf16 %v202_v9, %v201_v24  ;;  %v280_v11 = vsub.f32 %v1005_v7, %v202_v9  ;;  %v297_v63 = vadd.f32 %v282_v6, %v281_v2  ;;  %v507_v27 = vpop.xlane.xlu0 %506  ;;  %v523_v40 = vsub.f32 %v515_v36, %v519_v37 }
 0x4c6   :  { %v512_v60 = vmul.f32 2e-06, %v507_v27  ;;  %v499_v34 = vpop.xlane.xlu1 %498  ;;  %v567_v22 = vsub.f32 %v515_v36, %v563_v28 }
 0x4c7   :  { %754 = vmatmul.mubr.bf16.vlgmr.msra.gmra.mrb[0].mxu1 %v204_v62  ;;  %v284_v3 = vmul.f32 %v280_v11, %v280_v11  ;;  %v298_v13 = vadd.f32 %v297_v63, %v283_v12 }
 0x4c8   :  { %v516_v7 = vadd.f32 %v512_v60, %v499_v34 }
 0x4c9   :  { %v299_v0 = vadd.f32 %v298_v13, %v284_v3  ;;  %v509_v30 = vpop.xlane.xlu0 %508 }
 0x4ca   :  { %v467_v42 = vpop.xlane.xlu1 %466  ;;  %v524_v43 = vsub.f32 %v516_v7, %v520_v8  ;;  %v513_v47 = vmul.f32 2e-06, %v509_v30  ;;  %v568_v54 = vsub.f32 %v516_v7, %v564_v20 }
 0x4cb   :  { %300 = vadd.xlane.f32.xlu0 %v299_v0  ;;  %v526_v48 = vadd.f32 %v522_v10, %v467_v42 }
 0x4cd   :  { %v469_v1 = vpop.xlane.xlu0 %468  ;;  %v1167_v52 = vmax.f32 %v526_v48, 0.0 }
 0x4ce   :  { %v527_v45 = vadd.f32 %v523_v40, %v469_v1  ;;  %v501_v50 = vpop.xlane.xlu1 %500 }
 0x4cf   :  { %v517_v53 = vadd.f32 %v513_v47, %v501_v50  ;;  %vm536_vm0 = vcmp.eq.f32.partialorder %v1167_v52, inf  ;;  %vm538_vm2 = vcmp.eq.f32.partialorder %v1167_v52, 0.0 }
 0x4d0   :  { %v1161_v49 = vmax.f32 %v527_v45, 0.0  ;;  %v539_v45 = vand.u32 2147483648, %v1167_v52 }
 0x4d1   :  { %v471_v41 = vpop.xlane.xlu0 %470  ;;  %v525_v33 = vsub.f32 %v517_v53, %v521_v55  ;;  %v569_v2 = vsub.f32 %v517_v53, %v565_v59 }
 0x4d2   :  { %v528_v46 = vadd.f32 %v524_v43, %v471_v41  ;;  %796 = vrsqrt.f32 %v1161_v49  ;;  %vm543_vm8 = vcmp.eq.f32.partialorder %v1161_v49, inf  ;;  %vm545_vm9 = vcmp.eq.f32.partialorder %v1161_v49, 0.0 }
 0x4d3   :  { %v546_v13 = vand.u32 2147483648, %v1161_v49 }
 0x4d4   :  { %v1163_v51 = vmax.f32 %v528_v46, 0.0 }
 0x4d6   :  { %798 = vrsqrt.f32 %v1163_v51  ;;  %vm550_vm10 = vcmp.eq.f32.partialorder %v1163_v51, inf  ;;  %vm552_vm11 = vcmp.eq.f32.partialorder %v1163_v51, 0.0  ;;  %v553_v26 = vand.u32 2147483648, %v1163_v51 }
 0x4d7   :  { %800 = vrsqrt.f32 %v1167_v52 }
 0x4dc   :  { %v797_v29 = vpop.eup %796 }
 0x4dd   :  { %v542_v12 = vmul.f32 %v797_v29, %v1161_v49 }
 0x4df   :  { %v544_v4 = vsel %vm543_vm8, %v1161_v49, %v542_v12  ;;  %vm622_vm8 = vcmask 7168  }
 0x4e0   :  { %v799_v9 = vpop.eup %798  ;;  %v547_v35 = vsel %vm545_vm9, %v546_v13, %v544_v4 }
 0x4e1   :  { %v801_v63 = vpop.eup %800  ;;  %v549_v38 = vmul.f32 %v799_v9, %v1163_v51 }
 0x4e2   :  { %v535_v18 = vmul.f32 %v801_v63, %v1167_v52 }
 0x4e3   :  { %v551_v5 = vsel %vm550_vm10, %v1163_v51, %v549_v38 }
 0x4e4   :  { %v554_v8 = vsel %vm552_vm11, %v553_v26, %v551_v5  ;;  %v537_v41 = vsel %vm536_vm0, %v1167_v52, %v535_v18 }
 0x4e5   :  { %v540_v49 = vsel %vm538_vm2, %v539_v45, %v537_v41 }
 0x53f   :  { %v485_v17 = vpop.xlane.xlu0 %484  ;;  %v487_v15 = vpop.xlane.xlu1 %486 }
 0x540   :  { %v571_v23 = vadd.f32 %v567_v22, %v485_v17  ;;  %v572_v16 = vadd.f32 %v568_v54, %v487_v15 }
 0x542   :  { %v575_v31 = vmax.f32 %v571_v23, 0.0  ;;  %v576_v57 = vmax.f32 %v572_v16, 0.0 }
 0x543   :  { %v473_v14 = vpop.xlane.xlu0 %472  ;;  %v483_v24 = vpop.xlane.xlu1 %482 }
 0x544   :  { %802 = vrsqrt.f32 %v575_v31  ;;  %v529_v21 = vadd.f32 %v525_v33, %v473_v14  ;;  %v570_v61 = vadd.f32 %v566_v58, %v483_v24  ;;  %vm587_vm12 = vcmp.eq.f32.partialorder %v575_v31, inf }
 0x545   :  { %804 = vrsqrt.f32 %v576_v57  ;;  %v590_v30 = vand.u32 2147483648, %v575_v31  ;;  %vm589_vm13 = vcmp.eq.f32.partialorder %v575_v31, 0.0  ;;  %vm594_vm14 = vcmp.eq.f32.partialorder %v576_v57, inf }
 0x546   :  { %v1175_v25 = vmax.f32 %v529_v21, 0.0  ;;  %v574_v19 = vmax.f32 %v570_v61, 0.0  ;;  %v597_v34 = vand.u32 2147483648, %v576_v57  ;;  %vm596_vm15 = vcmp.eq.f32.partialorder %v576_v57, 0.0 }
 0x547   :  { %v489_v6 = vpop.xlane.xlu1 %488 }
 0x548   :  { %806 = vrsqrt.f32 %v1175_v25  ;;  %v573_v62 = vadd.f32 %v569_v2, %v489_v6  ;;  %vm580_vm1 = vcmp.eq.f32.partialorder %v574_v19, inf  ;;  %v583_v46 = vand.u32 2147483648, %v574_v19 }
 0x549   :  { %808 = vrsqrt.f32 %v574_v19  ;;  %vm582_vm3 = vcmp.eq.f32.partialorder %v574_v19, 0.0  ;;  %vm557_vm4 = vcmp.eq.f32.partialorder %v1175_v25, inf  ;;  %vm559_vm5 = vcmp.eq.f32.partialorder %v1175_v25, 0.0 }
 0x54a   :  { %v1178_v11 = vmax.f32 %v573_v62, 0.0  ;;  %v560_v52 = vand.u32 2147483648, %v1175_v25 }
 0x54c   :  { %810 = vrsqrt.f32 %v1178_v11  ;;  %vm601_vm6 = vcmp.eq.f32.partialorder %v1178_v11, inf  ;;  %v604_v17 = vand.u32 2147483648, %v1178_v11  ;;  %vm603_vm7 = vcmp.eq.f32.partialorder %v1178_v11, 0.0 }
 0x54e   :  { %v803_v3 = vpop.eup %802 }
 0x54f   :  { %v805_v0 = vpop.eup %804  ;;  %v586_v27 = vmul.f32 %v803_v3, %v575_v31 }
 0x550   :  { %v593_v32 = vmul.f32 %v805_v0, %v576_v57 }
 0x551   :  { %v588_v60 = vsel %vm587_vm12, %v575_v31, %v586_v27 }
 0x552   :  { %v807_v1 = vpop.eup %806  ;;  %v591_v36 = vsel %vm589_vm13, %v590_v30, %v588_v60  ;;  %v595_v7 = vsel %vm594_vm14, %v576_v57, %v593_v32 }
 0x553   :  { %v809_v37 = vpop.eup %808  ;;  %v598_v39 = vsel %vm596_vm15, %v597_v34, %v595_v7  ;;  %v607_v40 = vsub.f32 %v547_v35, %v591_v36  ;;  %v556_v42 = vmul.f32 %v807_v1, %v1175_v25 }
 0x554   :  { %v579_v43 = vmul.f32 %v809_v37, %v574_v19  ;;  %v608_v44 = vsub.f32 %v554_v8, %v598_v39 }
 0x555   :  { %v611_v47 = vadd.f32 1.0, %v607_v40  ;;  %v558_v28 = vsel %vm557_vm4, %v1175_v25, %v556_v42 }
 0x556   :  { %v581_v10 = vsel %vm580_vm1, %v574_v19, %v579_v43  ;;  %v811_v48 = vpop.eup %810  ;;  %v612_v22 = vadd.f32 1.0, %v608_v44  ;;  %v561_v16 = vsel %vm559_vm5, %v560_v52, %v558_v28 }
 0x557   :  { %v584_v50 = vsel %vm582_vm3, %v583_v46, %v581_v10  ;;  %v600_v20 = vmul.f32 %v811_v48, %v1178_v11  ;;  %v615_v23 = vmax.f32 %v611_v47, 0.0 }
 0x558   :  { %v301_v51 = vpop.xlane.xlu0 %300  ;;  %v606_v53 = vsub.f32 %v540_v49, %v584_v50  ;;  %v616_v58 = vmax.f32 %v612_v22, 0.0 }
 0x559   :  { %v302_v54 = vrot.slane %v301_v51, 4  ;;  %v602_v55 = vsel %vm601_vm6, %v1178_v11, %v600_v20  ;;  %v624_v59 = vsel %vm622_vm8, %v615_v23, 0.0 }
 0x55a   :  { %v610_v15 = vadd.f32 1.0, %v606_v53  ;;  %v605_v31 = vsel %vm603_vm7, %v604_v17, %v602_v55  ;;  %v626_v29 = vsel %vm622_vm8, %v616_v58, 0.0 }
 0x55b   :  { %v303_v56 = vadd.f32 %v302_v54, %v301_v51  ;;  %v609_v33 = vsub.f32 %v561_v16, %v605_v31 }
 0x55c   :  { %v614_v57 = vmax.f32 %v610_v15, 0.0 }
 0x55d   :  { %v304_v14 = vrot.slane %v303_v56, 2  ;;  %v613_v24 = vadd.f32 1.0, %v609_v33 }
 0x55e   :  { %v623_v21 = vsel %vm622_vm8, %v614_v57, 0.0 }
 0x55f   :  { %v625_v61 = vadd.f32 %v624_v59, %v623_v21  ;;  %v305_v19 = vadd.f32 %v304_v14, %v303_v56  ;;  %v617_v2 = vmax.f32 %v613_v24, 0.0 }
 0x561   :  { %v627_v6 = vadd.f32 %v626_v29, %v625_v61  ;;  %v306_v9 = vrot.slane %v305_v19, 1  ;;  %v628_v62 = vsel %vm622_vm8, %v617_v2, 0.0 }
 0x563   :  { %v629_v11 = vadd.f32 %v628_v62, %v627_v6  ;;  %v307_v12 = vadd.f32 %v306_v9, %v305_v19 }
 0x565   :  { %630 = vadd.xlane.f32.xlu1 %v629_v11  ;;  %757 = vpush %v307_v12 }
 0x596   :  { %s758_s2 = spop %757 }
 0x597   :  { %v639_v25 = vstv %s758_s2 }
 0x598   :  { %640 = vst [vmem:[#allocation8] sm:$0xff] %v639_v25 }
 0x59a   :  { %v755_v63 = vpop.f32.mrb[0].mxu1 }
 0x59b   :  { %260 = vst [vmem:[#allocation7 + $0x28] sm:$0xff] %v755_v63  ;;  %v239_v38 = vpop.f32.mrb[1].mxu1 }
 0x59c   :  { %258 = vst [vmem:[#allocation7 + $0x8] sm:$0xff] %v239_v38  ;;  %v756_v3 = vpop.f32.mrb[2].mxu1 }
 0x59d   :  { %261 = vst [vmem:[#allocation7 + $0x38] sm:$0xff] %v756_v3  ;;  %v242_v13 = vpop.f32.mrb[3].mxu1 }
 0x59e   :  { %259 = vst [vmem:[#allocation7 + $0x18] sm:$0xff] %v242_v13 }
 0x59f   :  { %867 = shalt.err (!%p864_p6)
}
 0x5a0   :  { %s868_s28 = scalar_lea.hbm %s1259_s4, 128 }
 0x5a1   :  { %p869_p7 = scmp.ne.s32.totalorder %s1259_s4, %s868_s28  ;;  %p872_p8 = scmp.lt.u32.totalorder %s868_s28, %s1259_s4 }
 0x5a3   :  { %p874_p9 = pnand %p872_p8, %p869_p7 }
 0x5a5   :  { %877 = shalt.err (!%p874_p9)
}
 0x5a6   :  { %664 = dma.vmem_to_hbm [thread:$0]  %s662_s22, 128, %s1259_s4, [#allocation9]  }
 0x5a7   :  { %s878_s10 = scalar_lea.vmem %s1212_s24, 1024  ;;  %p883_p11 = scmp.lt.s32.totalorder %s1212_s24, %s1212_s24 }
 0x5a8   :  { %p879_p10 = scmp.ne.s32.totalorder %s1212_s24, %s878_s10  ;;  %p884_p12 = scmp.lt.s32.totalorder %s878_s10, %s878_s10 }
 0x5aa   :  { %p885_p13 = por %p884_p12, %p883_p11 }
 0x5ac   :  { %p886_p0 = pnand %p885_p13, %p879_p10 }
 0x5ae   :  { %889 = shalt.err (!%p886_p0)
}
 0x5af   :  { %s890_s13 = scalar_lea.hbm %s1258_s3, 1024 }
 0x5b0   :  { %p891_p1 = scmp.ne.s32.totalorder %s1258_s3, %s890_s13  ;;  %p894_p2 = scmp.lt.u32.totalorder %s890_s13, %s1258_s3 }
 0x5b2   :  { %p896_p3 = pnand %p894_p2, %p891_p1 }
 0x5b4   :  { %899 = shalt.err (!%p896_p3)
}
 0x5b5   :  { %s938_s4 = smov 256   ;;  %s939_s17 = smov 16  }
 0x5b6   :  { %654 = dma.vmem_to_hbm [thread:$0]  %s1212_s24, 1024, %s1258_s3, [#allocation4], %s938_s4, %s938_s4, %s939_s17  }
 0x5b7   :  { %s940_s1 = smov [#allocation10]  }
 0x5b8   :  { %s671_s20 = sshll.u32 %s940_s1, 4  ;;  %s672_s20 = int_to_ptr.vmem [resolvable:$true] %s671_s20 }
 0x5b9   :  { %s900_s21 = scalar_lea.vmem %s672_s20, 128  ;;  %p905_p5 = scmp.lt.s32.totalorder %s672_s20, %s672_s20 }
 0x5ba   :  { %p901_p4 = scmp.ne.s32.totalorder %s672_s20, %s900_s21  ;;  %p906_p6 = scmp.lt.s32.totalorder %s900_s21, %s900_s21 }
 0x5bc   :  { %p907_p7 = por %p906_p6, %p905_p5 }
 0x5be   :  { %p908_p8 = pnand %p907_p7, %p901_p4 }
 0x5f2   :  { %v631_v0 = vpop.xlane.xlu1 %630 }
 0x5f3   :  { %v632_v18 = vrot.slane %v631_v0, 4 }
 0x5f5   :  { %v633_v4 = vadd.f32 %v632_v18, %v631_v0 }
 0x5f7   :  { %v634_v26 = vrot.slane %v633_v4, 2 }
 0x5f9   :  { %v635_v27 = vadd.f32 %v634_v26, %v633_v4 }
 0x5fb   :  { %v636_v5 = vrot.slane %v635_v27, 1 }
 0x5fd   :  { %v637_v30 = vadd.f32 %v636_v5, %v635_v27 }
 0x5ff   :  { %759 = vpush %v637_v30 }
 0x630   :  { %s760_s2 = spop %759 }
 0x631   :  { %v641_v32 = vstv %s760_s2 }
 0x632   :  { %642 = vst [vmem:[#allocation10] sm:$0xff] %v641_v32 }
 0x633   :  { %911 = shalt.err (!%p908_p8)
}
 0x634   :  { %s912_s23 = scalar_lea.hbm %s1260_s5, 128 }
 0x635   :  { %p913_p9 = scmp.ne.s32.totalorder %s1260_s5, %s912_s23  ;;  %p916_p10 = scmp.lt.u32.totalorder %s912_s23, %s1260_s5 }
 0x637   :  { %p918_p11 = pnand %p916_p10, %p913_p9 }
 0x639   :  { %921 = shalt.err (!%p918_p11)
}
 0x63a   :  { %674 = dma.vmem_to_hbm [thread:$0]  %s672_s20, 128, %s1260_s5, [#allocation9]  }
 0x63b   :  { %926 = dma.done.wait [#allocation4], 1024  }
 0x63c   :  { %927 = vsyncadd [#allocation4], 4294966272 }
 0x63d   :  { %928 = dma.done.wait [#allocation9], 256  }
 0x63e   :  { %929 = vsyncadd [#allocation9], 4294967040 }
 0x63f   :  { %684 = vsyncpa [#allocation3], 1 }
 0x640   :  { %685 = vsyncpa [#allocation6], 1 }
 0x641   :  { %686 = vsyncpa [#allocation4], 1 }
 0x642   :  { %687 = vsyncpa [#allocation9], 1 }

</bundles_post_ra>
